<compile_context>
chip_gen: v7x
topology: tpu7x:2x2x1
jax: 0.10.0
libtpu: 0.0.40
codegen_flags: <defaults>
</compile_context>

<pallas_src>
import jax
import jax.numpy as jnp
from jax.experimental import pallas as pl
from jax.experimental.pallas import tpu as pltpu


# ----------------------------- encoding table ------------------------------ #

def make_encoding(max_len: int, hidden_dim: int) -> jnp.ndarray:
    """Reproduces the PyTorch __init__ computation (including its broadcasting quirk)."""
    assert hidden_dim % 2 == 0
    # torch: position = arange(max_len).view(1, -1) ; index = arange(0, hidden_dim, 2)
    position = jnp.arange(max_len, dtype=jnp.float32).reshape(1, -1)      # (1, max_len)
    index = jnp.arange(0, hidden_dim, 2, dtype=jnp.float32)               # (hidden_dim//2,)
    denom = 10000.0 ** (index / float(hidden_dim))                        # (hidden_dim//2,)
    # Broadcast (1, max_len) / (hidden_dim//2,) -> requires max_len == hidden_dim//2,
    # exactly as in the PyTorch source.
    vals = position / denom                                               # (1, max_len)
    enc = jnp.zeros((max_len, hidden_dim), dtype=jnp.float32)
    enc = enc.at[:, 0::2].set(jnp.sin(vals))   # broadcasts the single row everywhere
    enc = enc.at[:, 1::2].set(jnp.cos(vals))
    return enc


# --------------------------------- kernel ---------------------------------- #

def pe_add_kernel(x_ref, enc_ref, o_ref):
    # x_ref/o_ref: (ts, D) (batch dim squeezed) or (Bt, ts, D); enc_ref: (ts, D).
    # jnp broadcasting handles both cases.
    o_ref[...] = x_ref[...] + enc_ref[...]


# ----------------------------- tiling helpers ------------------------------ #

_MIN_GRID_STEPS = 4          # >= 2 grid steps per TensorCore on v7x (2 TCs/chip)
_VMEM_BUDGET_CAP = 48 << 20  # stays under v7x's 64 MiB physical VMEM with headroom


def _cdiv(a: int, b: int) -> int:
    return -(-a // b)


def _round_up(x: int, m: int) -> int:
    return _cdiv(x, m) * m


def _vmem_budget_bytes() -> int:
    """Usable VMEM budget for this kernel, derived from the hardware when possible."""
    try:
        cap = int(pltpu.get_tpu_info().vmem_capacity_bytes)
    except Exception:
        cap = 64 << 20  # conservative: v7x per-TC physical VMEM
    return min((cap * 3) // 4, _VMEM_BUDGET_CAP)


def _pick_tiles(B: int, S: int, D: int, itemsize: int, budget: int,
                seq_tile=None, batch_tile=None):
    """Pick (seq_tile, batch_tile). Auto tiles target ~budget/8 bytes per x/out tile,
    so the 6 double-buffered tiles (x, enc, out) use <= ~0.75 * budget."""
    sublane = {4: 8, 2: 16, 1: 32}.get(itemsize, 8)
    s_pad = _round_up(S, sublane)
    target = max(sublane * D * itemsize, budget // 8)

    if seq_tile is not None:
        ts = max(sublane, _round_up(min(seq_tile, s_pad), sublane))
    else:
        rows = max(sublane, target // max(1, D * itemsize))
        ts = max(sublane, min((rows // sublane) * sublane, s_pad))

    if batch_tile is not None:
        bt = max(1, min(batch_tile, B))
    else:
        bt = 1
        if ts >= s_pad:
            # Whole sequence fits one tile: spend leftover budget on batch blocking.
            bt = max(1, min(B, target // max(1, ts * D * itemsize)))

    if seq_tile is None and batch_tile is None:
        # Keep enough grid steps for megacore sharding (v7x: 2 TCs/chip).
        def steps(ts_, bt_):
            return _cdiv(S, ts_) * _cdiv(B, bt_)
        while steps(ts, bt) < _MIN_GRID_STEPS and bt > 1:
            bt = max(1, bt // 2)
        while steps(ts, bt) < _MIN_GRID_STEPS and ts > sublane:
            ts = max(sublane, ((ts // 2) // sublane) * sublane)

    return ts, bt


# -------------------------------- forward ----------------------------------- #

def positional_encoding_forward(x: jnp.ndarray, encoding: jnp.ndarray, *,
                                seq_tile: int | None = None,
                                batch_tile: int | None = None,
                                min_pallas_bytes: int = 1 << 20,
                                force_pallas: bool = False) -> jnp.ndarray:
    """forward(x) = x + encoding[:seq_len, :]. `encoding` is the full (max_len, D) table."""
    B, S, D = x.shape
    max_len, enc_d = encoding.shape
    assert enc_d == D, f"hidden_dim mismatch: x has {D}, encoding has {enc_d}"
    assert S <= max_len, f"seq_len ({S}) exceeds max_len ({max_len})"

    if encoding.dtype != x.dtype:
        # Callers (PositionalEncoding class) pre-cast and cache; this is a safety net.
        encoding = encoding.astype(x.dtype)

    itemsize = jnp.dtype(x.dtype).itemsize

    # For tiny problems a fused XLA add beats any pallas_call launch/DMA overhead.
    if not force_pallas and x.size * itemsize < min_pallas_bytes:
        return x + encoding[:S, :]

    budget = _vmem_budget_bytes()
    ts, bt = _pick_tiles(B, S, D, itemsize, budget,
                         seq_tile=seq_tile, batch_tile=batch_tile)
    grid = (_cdiv(S, ts), _cdiv(B, bt))

    # Squeeze the unit batch dim out of the kernel refs when not batch-blocking.
    if bt == 1:
        x_block = (pl.Squeezed(), ts, D)
    else:
        x_block = (bt, ts, D)

    # Grid order (seq_tiles, batch_tiles): batch innermost, so the enc block index is
    # unchanged across consecutive steps and the enc tile is not re-DMA'd per batch step.
    return pl.pallas_call(
        pe_add_kernel,
        out_shape=jax.ShapeDtypeStruct((B, S, D), x.dtype),
        grid=grid,
        in_specs=[
            pl.BlockSpec(x_block, lambda s, b: (b, s, 0)),
            pl.BlockSpec((ts, D), lambda s, b: (s, 0)),   # slices the full table: free [:S]
        ],
        out_specs=pl.BlockSpec(x_block, lambda s, b: (b, s, 0)),
        compiler_params=pltpu.CompilerParams(
            dimension_semantics=("parallel", "parallel"),
            vmem_limit_bytes=int(budget)),
    )(x, encoding)


class PositionalEncoding:
    """Mirror of the PyTorch module: precompute the table once, add it in forward."""

    def __init__(self, max_len: int, hidden_dim: int):
        self.max_len = max_len
        self.hidden_dim = hidden_dim
        enc = make_encoding(max_len, hidden_dim)
        # Cache per-dtype casts so forward never re-materializes the table.
        self._enc_cache = {jnp.dtype(jnp.float32): enc}

    def encoding_for(self, dtype) -> jnp.ndarray:
        dt = jnp.dtype(dtype)
        if dt not in self._enc_cache:
            self._enc_cache[dt] = self._enc_cache[jnp.dtype(jnp.float32)].astype(dt)
        return self._enc_cache[dt]

    def __call__(self, x: jnp.ndarray, **kwargs) -> jnp.ndarray:
        return positional_encoding_forward(x, self.encoding_for(x.dtype), **kwargs)


# ---------------------------------- tests ----------------------------------- #

if __name__ == "__main__":
    key = jax.random.PRNGKey(0)
    k1, k2, k3 = jax.random.split(key, 3)

    # --- Test 1: small module-consistent shapes (max_len == hidden_dim // 2). ---
    max_len, hidden_dim = 32, 64
    batch, seq_len = 2, 16
    pe = PositionalEncoding(max_len, hidden_dim)
    x1 = jax.random.normal(k1, (batch, seq_len, hidden_dim), dtype=jnp.float32)

    out1 = jax.block_until_ready(pe(x1, force_pallas=True))   # force the Pallas path
    ref1 = x1 + pe.encoding_for(jnp.float32)[:seq_len, :]
    assert out1.shape == x1.shape and out1.dtype == x1.dtype
    assert jnp.allclose(out1, ref1, atol=1e-6, rtol=1e-6)

    out1_fb = jax.block_until_ready(pe(x1))                   # fused-XLA fallback path
    assert jnp.allclose(out1_fb, ref1, atol=1e-6, rtol=1e-6)

    # --- Test 2: explicit seq + batch tiling with partial tiles on both axes (f32). ---
    max_len2, hidden_dim2 = 256, 512
    pe2 = PositionalEncoding(max_len2, hidden_dim2)
    B2, S2 = 3, 250
    x2 = jax.random.normal(k2, (B2, S2, hidden_dim2), dtype=jnp.float32)
    out2 = jax.block_until_ready(
        pe2(x2, seq_tile=64, batch_tile=2, force_pallas=True))
    ref2 = x2 + pe2.encoding_for(jnp.float32)[:S2, :]
    assert jnp.allclose(out2, ref2, atol=1e-5, rtol=1e-5)

    # --- Test 3: bf16 path (16-row sublane packing, auto tile pick). ---
    B3, S3 = 2, 128
    x3 = jax.random.normal(k3, (B3, S3, hidden_dim2), dtype=jnp.bfloat16)
    out3 = jax.block_until_ready(pe2(x3, force_pallas=True))
    ref3 = x3 + pe2.encoding_for(jnp.bfloat16)[:S3, :]
    assert out3.dtype == jnp.bfloat16
    assert jnp.allclose(out3.astype(jnp.float32), ref3.astype(jnp.float32),
                        atol=1e-2, rtol=1e-2)

    print("KERNEL_OK")
</pallas_src>

<mosaic_0001>
module attributes {stable_mosaic.version = 11 : i64} {
  func.func @pe_add_kernel(%arg0: i32, %arg1: i32, %arg2: memref<1x8x64xf32, #tpu.memory_space<vmem>>, %arg3: memref<8x64xf32, #tpu.memory_space<vmem>>, %arg4: memref<1x8x64xf32, #tpu.memory_space<vmem>>) attributes {dimension_semantics = [#tpu.dimension_semantics<parallel>, #tpu.dimension_semantics<parallel>], iteration_bounds = array<i64: 2, 2>, scalar_prefetch = 0 : i64, scratch_operands = 0 : i64, tpu.core_type = #tpu.core_type<tc>, window_params = [{transform_indices = @transform_0, window_bounds = array<i64: 1, 8, 64>}, {transform_indices = @transform_1, window_bounds = array<i64: 8, 64>}, {transform_indices = @transform_2, window_bounds = array<i64: 1, 8, 64>}]} {
    %c0 = arith.constant 0 : index
    %c0_0 = arith.constant 0 : index
    %c0_1 = arith.constant 0 : index
    %0 = vector.load %arg2[%c0, %c0_0, %c0_1] : memref<1x8x64xf32, #tpu.memory_space<vmem>>, vector<1x8x64xf32>
    %1 = vector.shape_cast %0 : vector<1x8x64xf32> to vector<8x64xf32>
    %c0_2 = arith.constant 0 : index
    %c0_3 = arith.constant 0 : index
    %2 = vector.load %arg3[%c0_2, %c0_3] : memref<8x64xf32, #tpu.memory_space<vmem>>, vector<8x64xf32>
    %3 = arith.addf %1, %2 : vector<8x64xf32>
    %c0_4 = arith.constant 0 : index
    %c0_5 = arith.constant 0 : index
    %c0_6 = arith.constant 0 : index
    %4 = vector.load %arg4[%c0_4, %c0_5, %c0_6] : memref<1x8x64xf32, #tpu.memory_space<vmem>>, vector<1x8x64xf32>
    %5 = vector.shape_cast %4 : vector<1x8x64xf32> to vector<8x64xf32>
    %6 = vector.shape_cast %3 : vector<8x64xf32> to vector<1x8x64xf32>
    tpu.vector_store %arg4[%c0_4, %c0_5, %c0_6], %6 {strides = array<i32>} : memref<1x8x64xf32, #tpu.memory_space<vmem>>, vector<1x8x64xf32>,
    return
  }
  func.func @transform_0(%arg0: i32, %arg1: i32) -> (i32, i32, i32) {
    %c0_i32 = arith.constant 0 : i32
    %c0_i32_0 = arith.constant 0 : i32
    return %arg1, %arg0, %c0_i32 : i32, i32, i32
  }
  func.func @transform_1(%arg0: i32, %arg1: i32) -> (i32, i32) {
    %c0_i32 = arith.constant 0 : i32
    %c0_i32_0 = arith.constant 0 : i32
    return %arg0, %c0_i32 : i32, i32
  }
  func.func @transform_2(%arg0: i32, %arg1: i32) -> (i32, i32, i32) {
    %c0_i32 = arith.constant 0 : i32
    %c0_i32_0 = arith.constant 0 : i32
    return %arg1, %arg0, %c0_i32 : i32, i32, i32
  }
}

</mosaic_0001>

<bundles_post_ra>
// kernel: tpu_custom_call.1
= control target key start
LH: loop header
LB: loop body
LE: loop exit
PB: predicated region body
PF: predicated region fallthrough
CT: control target
= control target key end

     0   :  { %s975_s0 = inlined_call_operand.hbm [shape: f32[2,16,64], index: 0, kind: input, shape index: {}]   ;;  %s976_s1 = inlined_call_operand.hbm [shape: f32[32,64], index: 1, kind: input, shape index: {}]   ;;  %s977_s2 = inlined_call_operand.hbm [shape: f32[2,16,64], index: 2, kind: output, shape index: {}]  }
   0x1   :  { %987 = sst [smem:[#allocation14_spill]] %s977_s2 }
   0x2   :  { %7 = vsyncpa [#allocation3], 0 }
   0x3   :  { %9 = vsyncpa [#allocation3 + $0x1], 0 }
   0x4   :  { %10 = vsyncpa [#allocation6], 0 }
   0x5   :  { %12 = vsyncpa [#allocation6 + $0x1], 0 }
   0x6   :  { %13 = vsyncpa [#allocation4], 0 }
   0x7   :  { %15 = vsyncpa [#allocation4 + $0x1], 0  ;;  %s674_s9 = smov 0   ;;  %s676_s10 = smov 0  }
   0x8   :  { %s678_s11 = smov 0   ;;  %s680_s12 = smov 0  }
   0x9   :  { %s682_s13 = smov 0   ;;  %s684_s14 = smov 0  }
   0xa   :  { %s686_s15 = smov 0   ;;  %s688_s16 = smov 0  }
   0xb   :  { %s690_s17 = smov 0   ;;  %s692_s18 = smov 0  }
   0xc   :  { %s694_s19 = smov 0  }
   0xd LB: > { %988 = sst [smem:[#allocation11_spill]] %s626_s12  ;;  %s343_s20 = sadd.s32 4294967295, %s654_s19   ;;  %s654_s19 = sphi %s694_s19, %s21_s19   ;;  %s650_s18 = sphi %s692_s18, %s1022_s18   ;;  %s646_s17 = sphi %s690_s17, %s1021_s17   ;;  %s642_s16 = sphi %s688_s16, %s1020_s16   ;;  %s638_s15 = sphi %s686_s15, %s1019_s15   ;;  %s634_s14 = sphi %s684_s14, %s1018_s14   ;;  %s630_s13 = sphi %s682_s13, %s1017_s13   ;;  %s626_s12 = sphi %s680_s12, %s1016_s12   ;;  %s622_s11 = sphi %s678_s11, %s1015_s11   ;;  %s618_s10 = sphi %s676_s10, %s1014_s10   ;;  %s614_s9 = sphi %s674_s9, %s1013_s9  }
   0xe   : > { %s344_s21 = sadd.s32 4294967294, %s654_s19   ;;  %s30_s22 = sadd.s32 1, %s646_s17 }
   0xf   : > { %s33_s23 = sadd.s32 1, %s650_s18  ;;  %p31_p0 = scmp.ge.s32.totalorder %s30_s22, 2 }
  0x10   : > { %s42_s24 = sadd.s32 1, %s634_s14  ;;  %p49_p1 = scmp.ne.s32.totalorder %s634_s14, %s630_s13 }
  0x11   : > { %p982_p2 = scmp.eq.s32.totalorder %s654_s19, 0  ;;  %s1024_s22 = smov (%p31_p0, %s30_s22), 0 }
  0x12   : > { %989 = sst [smem:[#allocation12_spill]] %s1024_s22  ;;  %s1026_s23 = smov (!%p31_p0, %s33_s23), %s650_s18 }
  0x13   : > { %s37_s25 = ssub.s32 %s646_s17, %s1024_s22  ;;  %p744_p3 = por %p982_p2, %p49_p1 }
  0x14   : > { %p35_p4 = scmp.ge.s32.totalorder %s1026_s23, 2  ;;  %p55_p5 = scmp.ne.s32.totalorder %s630_s13, %s626_s12 }
  0x15   : > { %p750_p6 = scmp.eq.s32.totalorder %s343_s20, 0  ;;  %p107_p7 = scmp.eq.s32.totalorder %s343_s20, 3 }
  0x16   : > { %s1028_s23 = smov (%p35_p4, %s1026_s23), 0  ;;  %p113_p10 = scmp.eq.s32.totalorder %s344_s21, 3 }
  0x17   : > { %992 = sst [smem:[#allocation13_spill]] %s1028_s23  ;;  %p758_p8 = por %p750_p6, %p55_p5 }
  0x18   : > { %p762_p9 = por %p107_p7, %p49_p1  ;;  %s768_s30 = ssub.s32 %s650_s18, %s1028_s23 }
  0x19   : > { %s993_s28 = scalar_select %p758_p8, 1, 0 }
  0x1a   : > { %s994_s29 = scalar_select %p762_p9, 1, 0 }
  0x1b   : > { %s39_s3 = sor.u32 %s768_s30, %s37_s25  ;;  %p772_p13 = por %p113_p10, %p55_p5 }
  0x1c   : > { %p40_p12 = scmp.eq.s32.totalorder %s39_s3, 0  ;;  %p983_p0 = scmp.lt.s32.totalorder %s654_s19, 4 }
  0x1d   : > { %s995_s4 = scalar_select %p772_p13, 1, 0 }
  0x1e   : > { %s778_s5 = scalar_select %p40_p12, %s634_s14, %s42_s24  }
  0x1f   : > { %s133_s6 = sand.u32 1, %s634_s14   ;;  %s348_s7 = sshll.u32 %s646_s17, 1 }
  0x20   : > { %s347_s8 = sshll.u32 %s133_s6, 3  ;;  %s142_s20 = sadd.s32 %s650_s18, %s348_s7 }
  0x21   : > { %s349_s23 = sshll.u32 %s142_s20, 7  ;;  %s137_s21 = scalar_lea.vmem [#allocation2], %s347_s8 }
  0x22   : > { %s146_s22 = sshll.u32 %s137_s21, 4  ;;  %s786_s2 = scalar_lea.hbm %s975_s0, %s349_s23  ;;  %s788_s22 = int_to_ptr.vmem [resolvable:$true] %s146_s22 }
  0x23   : > { %p794_p1 = pnand %p983_p0, %p744_p3  ;;  %s134_s3 = scalar_lea.sflag [#allocation3], %s133_s6 }
  0x24   : > { %s468_s12 = scalar_lea.hbm %s786_s2, 128  ;;  %s473_s7 = scalar_lea.hbm %s975_s0, 512 }
  0x25   : > { %p469_p7 = scmp.ne.s32.totalorder %s786_s2, %s468_s12  ;;  %p470_p10 = pneg %p794_p1 }
  0x26   : > { %p474_p3 = scmp.lt.u32.totalorder %s786_s2, %s975_s0  ;;  %p475_p0 = scmp.lt.u32.totalorder %s473_s7, %s468_s12 }
  0x27   : > { %p471_p12 = pnand %p470_p10, %p469_p7  ;;  %p477_p4 = scmp.lt.u32.totalorder %s468_s12, %s786_s2 }
  0x28   : > { %p476_p11 = por %p475_p0, %p474_p3 }
  0x29   : > { %p472_p2 = pneg %p471_p12 }
  0x2a   : > { %p478_p5 = por %p477_p4, %p476_p11 }
  0x2c   : > { %p479_p13 = pnand %p478_p5, %p472_p2 }
  0x2e   : > { %482 = shalt.err (!%p479_p13)
}
  0x2f   : > { %s483_s6 = scalar_lea.vmem %s788_s22, 128  ;;  %s656_s21 = smov [#allocation2]  }
  0x30   : > { %p484_p7 = scmp.ne.s32.totalorder %s788_s22, %s483_s6  ;;  %s488_s25 = sshll.u32 %s656_s21, 4  ;;  %s489_s25 = int_to_ptr.vmem [resolvable:$false] %s488_s25 }
  0x31   : > { %s490_s23 = scalar_lea.vmem %s489_s25, 256  ;;  %p491_p8 = scmp.lt.s32.totalorder %s788_s22, %s489_s25 }
  0x32   : > { %p486_p12 = pnand %p484_p7, %p470_p10  ;;  %p492_p0 = scmp.lt.s32.totalorder %s490_s23, %s483_s6 }
  0x34   : > { %p487_p9 = pneg %p486_p12  ;;  %p493_p3 = por %p492_p0, %p491_p8 }
  0x36   : > { %p494_p11 = pnand %p493_p3, %p487_p9 }
  0x38   : > { %497 = shalt.err (!%p494_p11)
}
  0x39   : > { %370 = dma.hbm_to_vmem [thread:$0]  (!%p794_p1), %s786_s2, 128, %s788_s22, %s134_s3  }
  0x3a   : > { %p997_p2 = scmp.lt.s32.totalorder %s654_s19, 5  ;;  %p998_p8 = scmp.ge.s32.totalorder %s654_s19, 1 }
  0x3b   : > { %s68_s12 = sadd.s32 1, %s622_s11  ;;  %p1000_p13 = scmp.eq.s32.totalorder %s768_s30, 0 }
  0x3c   : > { %p829_p9 = pnand %p998_p8, %p997_p2  ;;  %p75_p4 = scmp.ne.s32.totalorder %s622_s11, %s618_s10 }
  0x3d   : > { %s837_s26 = scalar_select %p1000_p13, %s622_s11, %s68_s12  }
  0x3e   : > { %p81_p5 = scmp.ne.s32.totalorder %s618_s10, %s614_s9  ;;  %s153_s7 = sand.u32 1, %s622_s11  }
  0x3f   : > { %s351_s8 = sshll.u32 %s650_s18, 7  ;;  %p1001_p10 = scmp.eq.s32.totalorder %s654_s19, 0 }
  0x40   : > { %p849_p12 = por %p81_p5, %p750_p6  ;;  %s350_s2 = sshll.u32 %s153_s7, 3 }
  0x41   : > { %p77_p7 = por %p75_p4, %p1001_p10  ;;  %s856_s6 = scalar_lea.hbm %s976_s1, %s351_s8 }
  0x42   : > { %s1002_s20 = scalar_select %p849_p12, 1, 0 }
  0x43   : > { %s157_s9 = scalar_lea.vmem [#allocation5], %s350_s2  ;;  %p1003_p1 = scmp.lt.s32.totalorder %s654_s19, 4 }
  0x44   : > { %s164_s30 = sshll.u32 %s157_s9, 4  ;;  %s154_s27 = scalar_lea.sflag [#allocation6], %s153_s7  ;;  %s864_s30 = int_to_ptr.vmem [resolvable:$true] %s164_s30 }
  0x45   : > { %p860_p0 = pnand %p1003_p1, %p77_p7  ;;  %s498_s25 = scalar_lea.hbm %s856_s6, 128 }
  0x46   : > { %p499_p6 = scmp.ne.s32.totalorder %s856_s6, %s498_s25  ;;  %s503_s8 = scalar_lea.hbm %s976_s1, 512 }
  0x47   : > { %p500_p3 = pneg %p860_p0  ;;  %p504_p8 = scmp.lt.u32.totalorder %s856_s6, %s976_s1 }
  0x48   : > { %p505_p13 = scmp.lt.u32.totalorder %s503_s8, %s498_s25  ;;  %p507_p5 = scmp.lt.u32.totalorder %s498_s25, %s856_s6 }
  0x49   : > { %p501_p11 = pnand %p500_p3, %p499_p6 }
  0x4a   : > { %p506_p4 = por %p505_p13, %p504_p8 }
  0x4b   : > { %p502_p2 = pneg %p501_p11 }
  0x4c   : > { %p508_p10 = por %p507_p5, %p506_p4 }
  0x4e   : > { %p509_p7 = pnand %p508_p10, %p502_p2 }
  0x50   : > { %512 = shalt.err (!%p509_p7)
}
  0x51   : > { %s513_s7 = scalar_lea.vmem %s864_s30, 128  ;;  %s657_s3 = smov [#allocation5]  }
  0x52   : > { %p514_p1 = scmp.ne.s32.totalorder %s864_s30, %s513_s7  ;;  %s518_s9 = sshll.u32 %s657_s3, 4  ;;  %s519_s9 = int_to_ptr.vmem [resolvable:$false] %s518_s9 }
  0x53   : > { %s520_s23 = scalar_lea.vmem %s519_s9, 256  ;;  %p521_p12 = scmp.lt.s32.totalorder %s864_s30, %s519_s9 }
  0x54   : > { %p516_p6 = pnand %p514_p1, %p500_p3  ;;  %p522_p8 = scmp.lt.s32.totalorder %s520_s23, %s513_s7 }
  0x56   : > { %p517_p11 = pneg %p516_p6  ;;  %p523_p13 = por %p522_p8, %p521_p12 }
  0x58   : > { %p524_p4 = pnand %p523_p13, %p517_p11 }
  0x5a   : > { %527 = shalt.err (!%p524_p4)
}
  0x5b   : > { %373 = dma.hbm_to_vmem [thread:$0]  (!%p860_p0), %s856_s6, 128, %s864_s30, %s154_s27  }
  0x5c   : > { %173 = sbr.rel (%p829_p9) target bundleno = 132 (0x84), region = 28  ;;  %s894_s25 = sand.u32 (!%p829_p9), 1, %s630_s13  }
  0x5d   : > { %s353_s12 = sshll.u32 (!%p829_p9), %s894_s25, 3  ;;  %s176_s8 = scalar_lea.sflag (!%p829_p9), [#allocation3], %s894_s25 }
  0x5e   : > { %s179_s2 = scalar_lea.vmem (!%p829_p9), [#allocation2], %s353_s12  ;;  %p1005_p12 = scmp.ne.s32.totalorder (!%p829_p9), %s993_s28, 0 }
  0x63   : > { %601 = dma.done.wait (%p1005_p12), %s176_s8, 128  }
  0x64   : > { %603 = vsyncadd (%p1005_p12), %s176_s8, 4294967168  ;;  %s184_s6 = sand.u32 1, %s618_s10   ;;  %p1006_p9 = scmp.ne.s32.totalorder %s1002_s20, 0 }
  0x65   : > { %s354_s30 = sshll.u32 %s184_s6, 3  ;;  %s185_s24 = scalar_lea.sflag [#allocation6], %s184_s6 }
  0x66   : > { %s188_s21 = scalar_lea.vmem [#allocation5], %s354_s30 }
  0x67   : > { %605 = dma.done.wait (%p1006_p9), %s185_s24, 128  }
  0x68   : > { %607 = vsyncadd (%p1006_p9), %s185_s24, 4294967168  ;;  %s357_s27 = sshll.u32 %s638_s15, 1  ;;  %s213_s7 = scalar_lea.vmem [#allocation7], %s353_s12  ;;  %v214_v0 = vld [vmem:[%s179_s2] sm:$0xff]  ;;  %v215_v1 = vld [vmem:[%s188_s21] sm:$0xff]  ;;  %vm217_vm0 = vcmask 523264  }
  0x69   : > { %s231_s22 = sadd.s32 %s642_s16, %s357_s27  ;;  %s235_s28 = sshll.u32 %s213_s7, 4  ;;  %v216_v2 = vadd.f32 %v215_v1, %v214_v0  ;;  %s909_s28 = int_to_ptr.vmem [resolvable:$true] %s235_s28 }
  0x6a   : > { %s358_s3 = sshll.u32 %s231_s22, 7  ;;  %s1007_s8 = sld [smem:[#allocation14_spill]] }
  0x6b   : > { %218 = vst.msk [vmem:[%s213_s7] sm:$0xff] %vm217_vm0, %v216_v2  ;;  %s220_s15 = scalar_lea.sflag [#allocation4], %s894_s25  ;;  %s528_s16 = scalar_lea.vmem %s909_s28, 128 }
  0x6c   : > { %p529_p0 = scmp.ne.s32.totalorder %s909_s28, %s528_s16  ;;  %p1008_p3 = scmp.ne.s32.totalorder %s994_s29, 0 }
  0x6d   : > { %s658_s12 = smov [#allocation7]  }
  0x6e   : > { %p530_p2 = pnand %p529_p0, %p1008_p3  ;;  %s532_s2 = sshll.u32 %s658_s12, 4  ;;  %s533_s2 = int_to_ptr.vmem [resolvable:$false] %s532_s2 }
  0x6f   : > { %s534_s6 = scalar_lea.vmem %s533_s2, 256  ;;  %p535_p10 = scmp.lt.s32.totalorder %s909_s28, %s533_s2 }
  0x70   : > { %s914_s20 = scalar_lea.hbm %s1007_s8, %s358_s3  ;;  %p531_p5 = pneg %p530_p2 }
  0x71   : > { %p536_p7 = scmp.lt.s32.totalorder %s534_s6, %s528_s16 }
  0x73   : > { %p537_p1 = por %p536_p7, %p535_p10 }
  0x75   : > { %p538_p6 = pnand %p537_p1, %p531_p5 }
  0x77   : > { %541 = shalt.err (!%p538_p6)
}
  0x78   : > { %s542_s25 = scalar_lea.hbm %s914_s20, 128  ;;  %s546_s21 = scalar_lea.hbm %s1007_s8, 512 }
  0x79   : > { %p543_p11 = scmp.ne.s32.totalorder %s914_s20, %s542_s25  ;;  %p547_p4 = scmp.lt.u32.totalorder %s914_s20, %s1007_s8 }
  0x7a   : > { %p548_p12 = scmp.lt.u32.totalorder %s546_s21, %s542_s25  ;;  %p550_p0 = scmp.lt.u32.totalorder %s542_s25, %s914_s20 }
  0x7b   : > { %p544_p8 = pnand %p543_p11, %p1008_p3 }
  0x7c   : > { %p549_p9 = por %p548_p12, %p547_p4 }
  0x7d   : > { %p545_p13 = pneg %p544_p8 }
  0x7e   : > { %p551_p2 = por %p550_p0, %p549_p9 }
  0x80   : > { %p552_p5 = pnand %p551_p2, %p545_p13 }
  0x82   : > { %555 = shalt.err (!%p552_p5)
}
  0x83   : > { %365 = dma.vmem_to_hbm [thread:$0]  (%p1008_p3), %s909_s28, 128, %s914_s20, %s220_s15  }
  0x84 PF: > { %s1009_s7 = sld [smem:[#allocation11_spill]]  ;;  %p379_p10 = scmp.ge.s32.totalorder %s654_s19, 2 }
  0x85   : > { %p1010_p7 = scmp.ne.s32.totalorder %s995_s4, 0 }
  0x87   : > { %p375_p1 = pnand %p379_p10, %p1010_p7 }
  0x8a   : > { %s247_s3 = sand.u32 1, %s1009_s7  }
  0x8b   : > { %s248_s9 = scalar_lea.sflag [#allocation4], %s247_s3 }
  0x8c   : > { %609 = dma.done.wait (!%p375_p1), %s248_s9, 128  }
  0x8d   : > { %611 = vsyncadd (!%p375_p1), %s248_s9, 4294967168  ;;  %s21_s19 = sadd.s32 1, %s654_s19   ;;  %s1011_s29 = sld [smem:[#allocation12_spill]] }
  0x8e   : > { %p18_p6 = scmp.ge.s32.totalorder %s21_s19, 6   ;;  %s1012_s28 = sld [smem:[#allocation13_spill]] }
  0x8f   : > { %s1013_s9 = smov %s618_s10  ;;  %s1014_s10 = smov %s622_s11 }
  0x90   : > { %s1015_s11 = smov %s837_s26  ;;  %s1016_s12 = smov %s630_s13 }
  0x91   : > { %s1017_s13 = smov %s634_s14  ;;  %s1018_s14 = smov %s778_s5 }
  0x92   : > { %s1019_s15 = smov %s646_s17  ;;  %s1020_s16 = smov %s650_s18 }
  0x93   : > { %s1021_s17 = smov %s1011_s29  ;;  %20 = sbr.rel (!%p18_p6) target bundleno = 13 (0xd), region = 86 }
  0x94   : > { %s1022_s18 = smov %s1012_s28 }
  0x9a   :  { %253 = vsyncpa [#allocation3], 1 }
  0x9b   :  { %255 = vsyncpa [#allocation3 + $0x1], 1 }
  0x9c   :  { %256 = vsyncpa [#allocation6], 1 }
  0x9d   :  { %258 = vsyncpa [#allocation6 + $0x1], 1 }
  0x9e   :  { %259 = vsyncpa [#allocation4], 1 }
  0x9f   :  { %261 = vsyncpa [#allocation4 + $0x1], 1 }

</bundles_post_ra>
